<compile_context>
chip_gen: v5e
topology: v5e:2x2
jax: 0.10.0
libtpu: 0.0.40
codegen_flags: <defaults>
</compile_context>

<pallas_src>
import functools
import math

import jax
import jax.numpy as jnp
from jax.experimental import pallas as pl
from jax.experimental.pallas import tpu as pltpu


def _round_up(x, m):
    return ((x + m - 1) // m) * m


def _cdiv(a, b):
    return -(-a // b)


def _choose_tile(n, align, target):
    """Minimal padding + a tile that exactly divides the padded size.

    Returns (padded_n, tile).  Padding is bounded by align * num_blocks,
    never by a full tile (avoids the (1 + tile/N)^2 A-traffic blowup).
    """
    n_al = _round_up(n, align)
    target = max(align, (target // align) * align)
    if n_al <= target:
        return n_al, n_al
    nblocks = _cdiv(n_al, target)
    tile = _round_up(_cdiv(n_al, nblocks), align)
    return tile * nblocks, tile


def _physical_vmem_bytes():
    try:
        info = pltpu.get_tpu_info()
        v = getattr(info, "vmem_capacity_bytes", None)
        if v:
            return int(v)
    except Exception:
        pass
    return 64 * 1024 * 1024  # conservative: v7x per-TensorCore VMEM


def _gcn_kernel(a_ref, xw_ref, b_ref, o_ref, acc_ref, *, tile_k, xw_resident):
    # a_ref  : (tile_n, tile_k)   A block, original dtype (e.g. f32)
    # xw_ref : (N_cols_p, F_out_p) bf16 resident slab  OR  (tile_k, F_out_p) block
    # b_ref  : (1, F_out_p)       f32 bias
    # o_ref  : (tile_n, F_out_p)  output block (written at the last K step)
    # acc_ref: (tile_n, F_out_p)  f32 accumulator
    k = pl.program_id(1)

    @pl.when(k == 0)
    def _():
        acc_ref[...] = jnp.zeros_like(acc_ref)

    a_blk = a_ref[...].astype(jnp.bfloat16)  # VPU cast, hidden under the A DMA
    if xw_resident:
        start = pl.multiple_of(k * tile_k, 128)
        xw_blk = xw_ref[pl.ds(start, tile_k), :]
    else:
        xw_blk = xw_ref[...]

    acc_ref[...] += jnp.dot(a_blk, xw_blk, preferred_element_type=jnp.float32)

    @pl.when(k == pl.num_programs(1) - 1)
    def _():
        o_ref[...] = (acc_ref[...] + b_ref[...]).astype(o_ref.dtype)


def graph_convolution(X, A, W, b=None, *, tile_n_target=1024, tile_k_target=2048):
    """output = A @ X @ W + b  (b may be None); computed as A @ (X @ W) + b."""
    N, F_in = X.shape
    F_in_w, F_out = W.shape
    assert F_in_w == F_in
    assert A.shape == (N, N)

    out_dtype = X.dtype
    F_out_p = _round_up(F_out, 128)

    # --- tiny host-side matmul: XW = X @ W in f32, then lane-pad + bf16 ---
    XW = jnp.dot(X.astype(jnp.float32), W.astype(jnp.float32),
                 preferred_element_type=jnp.float32)

    # --- tiling: pad A minimally; tiles divide the padded dims exactly ---
    a_item = jnp.dtype(A.dtype).itemsize
    row_align = {4: 8, 2: 16, 1: 32}.get(a_item, 8)
    N_rows_p, tile_n = _choose_tile(N, row_align, tile_n_target)
    if N_rows_p == tile_n and tile_n >= 256:
        # Ensure >= 2 row blocks so both v7x TensorCores get work
        # (harmless extra grid step on single-core v5e/v6e).
        tile_n = _round_up(_cdiv(N_rows_p, 2), row_align)
        N_rows_p = 2 * tile_n
    N_cols_p, tile_k = _choose_tile(N, 128, tile_k_target)

    # --- A: stream as-is; copy/pad only when the shape requires it ---
    if (N_rows_p, N_cols_p) == (N, N):
        A_use = A
    else:
        A_use = jnp.zeros((N_rows_p, N_cols_p), A.dtype).at[:N, :N].set(A)

    XW_p = jnp.zeros((N_cols_p, F_out_p), jnp.bfloat16).at[:N, :F_out].set(
        XW.astype(jnp.bfloat16))
    if b is None:
        b_p = jnp.zeros((1, F_out_p), jnp.float32)
    else:
        b_p = jnp.zeros((1, F_out_p), jnp.float32).at[0, :F_out].set(
            b.astype(jnp.float32))

    grid = (N_rows_p // tile_n, N_cols_p // tile_k)

    # --- VMEM budget (generation-aware) ---
    phys = _physical_vmem_bytes()
    xw_bytes = N_cols_p * F_out_p * 2
    xw_resident = (2 * xw_bytes) <= (phys // 4)

    out_item = jnp.dtype(out_dtype).itemsize
    xw_buf_bytes = 2 * (xw_bytes if xw_resident else tile_k * F_out_p * 2)
    vmem_needed = (
        2 * tile_n * tile_k * a_item        # A blocks, double-buffered
        + xw_buf_bytes                      # XW slab / blocks
        + 2 * tile_n * F_out_p * out_item   # output blocks
        + tile_n * F_out_p * 4              # f32 accumulator scratch
        + 2 * F_out_p * 4                   # bias
    )
    vmem_limit = int(min(max(2 * vmem_needed, 32 * 1024 * 1024),
                         phys - 8 * 1024 * 1024))

    if xw_resident:
        xw_spec = pl.BlockSpec((N_cols_p, F_out_p), lambda i, k: (0, 0))
    else:
        xw_spec = pl.BlockSpec((tile_k, F_out_p), lambda i, k: (k, 0))

    kernel = functools.partial(_gcn_kernel, tile_k=tile_k,
                               xw_resident=xw_resident)

    out_p = pl.pallas_call(
        kernel,
        out_shape=jax.ShapeDtypeStruct((N_rows_p, F_out_p), out_dtype),
        grid_spec=pltpu.PrefetchScalarGridSpec(
            num_scalar_prefetch=0,
            grid=grid,
            in_specs=[
                pl.BlockSpec((tile_n, tile_k), lambda i, k: (i, k)),  # A block
                xw_spec,                                              # XW
                pl.BlockSpec((1, F_out_p), lambda i, k: (0, 0)),      # bias
            ],
            out_specs=pl.BlockSpec((tile_n, F_out_p), lambda i, k: (i, 0)),
            scratch_shapes=[pltpu.VMEM((tile_n, F_out_p), jnp.float32)],
        ),
        compiler_params=pltpu.CompilerParams(
            dimension_semantics=("parallel", "arbitrary"),
            vmem_limit_bytes=vmem_limit,
        ),
    )(A_use, XW_p, b_p)

    return out_p[:N, :F_out]


if __name__ == "__main__":
    # Small problem consistent with the module: N nodes, F_in -> F_out features.
    N, F_in, F_out = 256, 32, 64

    key = jax.random.PRNGKey(0)
    k_x, k_a, k_w, k_b = jax.random.split(key, 4)

    X = jax.random.normal(k_x, (N, F_in), dtype=jnp.float32)
    A = jax.random.normal(k_a, (N, N), dtype=jnp.float32)

    # Deterministic parameter init mirroring reset_parameters():
    #   stdv = 1 / sqrt(out_features); uniform(-stdv, stdv)
    stdv = 1.0 / math.sqrt(F_out)
    W = jax.random.uniform(k_w, (F_in, F_out), dtype=jnp.float32,
                           minval=-stdv, maxval=stdv)
    b = jax.random.uniform(k_b, (F_out,), dtype=jnp.float32,
                           minval=-stdv, maxval=stdv)

    out = graph_convolution(X, A, W, b)
    out = jax.block_until_ready(out)
    assert out.shape == (N, F_out)

    # Matched-precision reference: the kernel streams A and XW in bf16 with
    # f32 accumulation (vs. the fully-f32 PyTorch module this introduces
    # ~1e-2-level relative error — acceptable for GCNs).
    xw_ref = jnp.dot(X, W, preferred_element_type=jnp.float32)
    ref = jnp.dot(A.astype(jnp.bfloat16), xw_ref.astype(jnp.bfloat16),
                  preferred_element_type=jnp.float32) + b[None, :]
    assert jnp.allclose(out, ref, atol=5e-2, rtol=5e-2), "mismatch vs reference"

    print("KERNEL_OK")
</pallas_src>

<mosaic_0001>
module attributes {stable_mosaic.version = 11 : i64} {
  func.func @_gcn_kernel(%arg0: i32, %arg1: i32, %arg2: memref<128x256xf32, #tpu.memory_space<vmem>>, %arg3: memref<256x128xbf16, #tpu.memory_space<vmem>>, %arg4: memref<1x128xf32, #tpu.memory_space<vmem>>, %arg5: memref<128x128xf32, #tpu.memory_space<vmem>>, %arg6: memref<128x128xf32, #tpu.memory_space<vmem>>) attributes {dimension_semantics = [#tpu.dimension_semantics<parallel>, #tpu.dimension_semantics<arbitrary>], iteration_bounds = array<i64: 2, 1>, scalar_prefetch = 0 : i64, scratch_operands = 1 : i64, tpu.core_type = #tpu.core_type<tc>, window_params = [{transform_indices = @transform_0, window_bounds = array<i64: 128, 256>}, {pipeline_mode = #tpu.pipeline_mode<synchronous>, transform_indices = @transform_1, window_bounds = array<i64: 256, 128>}, {pipeline_mode = #tpu.pipeline_mode<synchronous>, transform_indices = @transform_2, window_bounds = array<i64: 1, 128>}, {transform_indices = @transform_3, window_bounds = array<i64: 128, 128>}]} {
    %c0_i32 = arith.constant 0 : i32
    %0 = arith.cmpi eq, %arg1, %c0_i32 : i32
    %1 = arith.extui %0 : i1 to i32
    %c0_i32_0 = arith.constant 0 : i32
    %2 = arith.cmpi ne, %1, %c0_i32_0 : i32
    scf.if %2 {
      %cst_9 = arith.constant 0.000000e+00 : f32
      %16 = vector.broadcast %cst_9 : f32 to vector<128x128xf32>
      %c0_10 = arith.constant 0 : index
      %c0_11 = arith.constant 0 : index
      %17 = vector.load %arg6[%c0_10, %c0_11] : memref<128x128xf32, #tpu.memory_space<vmem>>, vector<128x128xf32>
      tpu.vector_store %arg6[%c0_10, %c0_11], %16 {strides = array<i32>} : memref<128x128xf32, #tpu.memory_space<vmem>>, vector<128x128xf32>,
    } else {
    }
    %c0 = arith.constant 0 : index
    %c0_1 = arith.constant 0 : index
    %3 = vector.load %arg2[%c0, %c0_1] : memref<128x256xf32, #tpu.memory_space<vmem>>, vector<128x256xf32>
    %4 = arith.truncf %3 : vector<128x256xf32> to vector<128x256xbf16>
    %c256_i32 = arith.constant 256 : i32
    %5 = arith.muli %arg1, %c256_i32 : i32
    %6 = tpu.assume_multiple %5, 128 : i32
    %7 = arith.index_cast %6 : i32 to index
    %c0_2 = arith.constant 0 : index
    %8 = vector.load %arg3[%7, %c0_2] : memref<256x128xbf16, #tpu.memory_space<vmem>>, vector<256x128xbf16>
    %c0_3 = arith.constant 0 : index
    %c0_4 = arith.constant 0 : index
    %9 = vector.load %arg6[%c0_3, %c0_4] : memref<128x128xf32, #tpu.memory_space<vmem>>, vector<128x128xf32>
    %cst = arith.constant dense<0.000000e+00> : vector<128x128xf32>
    %10 = tpu.matmul %4, %8, %cst {dimension_numbers = #tpu.dot_dimension_numbers<[1], [0], [0], [1], [0, 0, 1, 1], [], []>} : vector<128x256xbf16>, vector<256x128xbf16>, vector<128x128xf32> -> vector<128x128xf32>
    %11 = arith.addf %9, %10 : vector<128x128xf32>
    %c0_5 = arith.constant 0 : index
    %c0_6 = arith.constant 0 : index
    %12 = vector.load %arg6[%c0_5, %c0_6] : memref<128x128xf32, #tpu.memory_space<vmem>>, vector<128x128xf32>
    tpu.vector_store %arg6[%c0_5, %c0_6], %11 {strides = array<i32>} : memref<128x128xf32, #tpu.memory_space<vmem>>, vector<128x128xf32>,
    %c0_i32_7 = arith.constant 0 : i32
    %13 = arith.cmpi eq, %arg1, %c0_i32_7 : i32
    %14 = arith.extui %13 : i1 to i32
    %c0_i32_8 = arith.constant 0 : i32
    %15 = arith.cmpi ne, %14, %c0_i32_8 : i32
    scf.if %15 {
      %c0_9 = arith.constant 0 : index
      %c0_10 = arith.constant 0 : index
      %16 = vector.load %arg6[%c0_9, %c0_10] : memref<128x128xf32, #tpu.memory_space<vmem>>, vector<128x128xf32>
      %c0_11 = arith.constant 0 : index
      %c0_12 = arith.constant 0 : index
      %17 = vector.load %arg4[%c0_11, %c0_12] : memref<1x128xf32, #tpu.memory_space<vmem>>, vector<1x128xf32>
      %18 = vector.broadcast %17 : vector<1x128xf32> to vector<128x128xf32>
      %19 = arith.addf %16, %18 : vector<128x128xf32>
      %c0_13 = arith.constant 0 : index
      %c0_14 = arith.constant 0 : index
      %20 = vector.load %arg5[%c0_13, %c0_14] : memref<128x128xf32, #tpu.memory_space<vmem>>, vector<128x128xf32>
      tpu.vector_store %arg5[%c0_13, %c0_14], %19 {strides = array<i32>} : memref<128x128xf32, #tpu.memory_space<vmem>>, vector<128x128xf32>,
    } else {
    }
    return
  }
  func.func @transform_0(%arg0: i32, %arg1: i32) -> (i32, i32) {
    %c0_i32 = arith.constant 0 : i32
    return %arg0, %arg1 : i32, i32
  }
  func.func @transform_1(%arg0: i32, %arg1: i32) -> (i32, i32) {
    %c0_i32 = arith.constant 0 : i32
    %c0_i32_0 = arith.constant 0 : i32
    %c0_i32_1 = arith.constant 0 : i32
    return %c0_i32, %c0_i32_0 : i32, i32
  }
  func.func @transform_2(%arg0: i32, %arg1: i32) -> (i32, i32) {
    %c0_i32 = arith.constant 0 : i32
    %c0_i32_0 = arith.constant 0 : i32
    %c0_i32_1 = arith.constant 0 : i32
    return %c0_i32, %c0_i32_0 : i32, i32
  }
  func.func @transform_3(%arg0: i32, %arg1: i32) -> (i32, i32) {
    %c0_i32 = arith.constant 0 : i32
    %c0_i32_0 = arith.constant 0 : i32
    return %arg0, %c0_i32 : i32, i32
  }
}

</mosaic_0001>

<bundles_post_ra>
// kernel: tpu_custom_call.1
= control target key start
LH: loop header
LB: loop body
LE: loop exit
PB: predicated region body
PF: predicated region fallthrough
CT: control target
= control target key end

     0   :  { %s1338_s0 = inlined_call_operand.hbm [shape: f32[256,256], index: 0, kind: input, shape index: {}]   ;;  %s1339_s1 = inlined_call_operand.hbm [shape: bf16[256,128], index: 1, kind: input, shape index: {}]   ;;  %s1340_s2 = inlined_call_operand.vmem [shape: f32[1,128], index: 2, kind: input, shape index: {}]   ;;  %s1341_s3 = inlined_call_operand.hbm [shape: f32[256,128], index: 3, kind: output, shape index: {}]  }
   0x1   :  { %1342 = sst [smem:[#allocation12_spill]] %s1339_s1 }
   0x2   :  { %8 = vsyncpa [#allocation4], 0 }
   0x3   :  { %10 = vsyncpa [#allocation4 + $0x1], 0 }
   0x4   :  { %11 = vsyncpa [#allocation7], 0 }
   0x5   :  { %12 = vsyncpa [#allocation5], 0 }
   0x6   :  { %14 = vsyncpa [#allocation5 + $0x1], 0  ;;  %s1114_s12 = smov 0   ;;  %s1116_s13 = smov 0  }
   0x7   :  { %s1118_s14 = smov 0   ;;  %s1120_s15 = smov 0  }
   0x8   :  { %s1122_s16 = smov 0   ;;  %s1124_s17 = smov 0  }
   0x9 LB: > { %s742_s18 = sadd.s32 4294967295, %s1085_s17   ;;  %s743_s19 = sadd.s32 4294967294, %s1085_s17   ;;  %s1085_s17 = sphi %s1124_s17, %s20_s17   ;;  %s1081_s16 = sphi %s1122_s16, %s1355_s16   ;;  %s1077_s15 = sphi %s1120_s15, %s1354_s15   ;;  %s1073_s14 = sphi %s1118_s14, %s1353_s14   ;;  %s1069_s13 = sphi %s1116_s13, %s1352_s13   ;;  %s1065_s12 = sphi %s1114_s12, %s1351_s12  }
   0xa   : > { %p54_p0 = scmp.ne.s32.totalorder %s1069_s13, %s1065_s12  ;;  %p1148_p1 = scmp.eq.s32.totalorder %s742_s18, 0 }
   0xb   : > { %p1152_p2 = scmp.eq.s32.totalorder %s742_s18, 1  ;;  %p126_p3 = scmp.eq.s32.totalorder %s743_s19, 1 }
   0xc   : > { %p1158_p4 = por %p1148_p1, %p54_p0  ;;  %p744_p5 = scmp.ge.s32.totalorder %s1085_s17, 1 }
   0xd   : > { %p1163_p6 = por %p126_p3, %p54_p0  ;;  %p133_p7 = scmp.lt.s32.totalorder %s1085_s17, 3 }
   0xe   : > { %s1347_s1 = sld [smem:[#allocation12_spill]]  ;;  %s1087_s28 = smov [#allocation6]  }
   0xf   : > { %p1171_p8 = pnand %p744_p5, %p133_p7  ;;  %s146_s29 = sshll.u32 %s1087_s28, 4  ;;  %s147_s29 = int_to_ptr.vmem [resolvable:$true] %s146_s29 }
  0x10   : > { %p746_p11 = scmp.ge.s32.totalorder %s1085_s17, 2  ;;  %s1088_s30 = smov 64  }
  0x11   : > { %p867_p9 = pneg %p1171_p8  ;;  %s1089_s4 = smov 4  }
  0x12   : > { %s32_s5 = sadd.s32 1, %s1081_s16  ;;  %s41_s6 = sadd.s32 1, %s1073_s14 }
  0x13   : > { %p868_p10 = pnand %p867_p9, %p1148_p1  ;;  %p34_p12 = scmp.ge.s32.totalorder %s32_s5, 2 }
  0x14   : > { %s144_s26 = sshll.u32 %s1347_s1, 4  ;;  %p48_p13 = scmp.ne.s32.totalorder %s1073_s14, %s1069_s13  ;;  %s145_s26 = int_to_ptr.hbm [resolvable:$true] %s144_s26 }
  0x15   : > { %870 = dma.hbm_to_vmem [thread:$0]  (!%p868_p10), %s145_s26, 2048, %s147_s29, [#allocation7], %s1088_s30, %s1088_s30, %s1089_s4  }
  0x16   : > { %p49_p0 = scmp.eq.s32.totalorder %s1085_s17, 0  ;;  %s1357_s5 = smov (%p34_p12, %s32_s5), 0 }
  0x17   : > { %p1193_p5 = por %p1152_p2, %p48_p13  ;;  %s36_s9 = ssub.s32 %s1081_s16, %s1357_s5 }
  0x18   : > { %p1187_p3 = por %p49_p0, %p48_p13  ;;  %p880_p7 = scmp.lt.s32.totalorder %s1085_s17, 2 }
  0x19   : > { %p39_p9 = scmp.eq.s32.totalorder %s36_s9, 0  ;;  %s163_s10 = sand.u32 1, %s1073_s14  }
  0x1a   : > { %s747_s11 = sshll.u32 %s163_s10, 8  ;;  %s825_s19 = sshll.u32 %s1081_s16, 8 }
  0x1b   : > { %s1202_s18 = scalar_select %p39_p9, %s1073_s14, %s41_s6  }
  0x1c   : > { %s175_s26 = scalar_lea.hbm %s1338_s0, %s825_s19  ;;  %s167_s28 = scalar_lea.vmem [#allocation3], %s747_s11 }
  0x1d   : > { %s178_s29 = sshll.u32 %s167_s28, 4  ;;  %s176_s21 = sshll.u32 %s175_s26, 4  ;;  %s179_s29 = int_to_ptr.vmem [resolvable:$true] %s178_s29  ;;  %s177_s21 = int_to_ptr.hbm [resolvable:$true] %s176_s21 }
  0x1e   : > { %p872_p2 = pnand %p880_p7, %p1187_p3  ;;  %s164_s30 = scalar_lea.sflag [#allocation4], %s163_s10 }
  0x1f   : > { %s1090_s4 = smov 256   ;;  %s1091_s1 = smov 16  }
  0x20   : > { %874 = dma.hbm_to_vmem [thread:$0]  (!%p872_p2), %s177_s21, 4096, %s179_s29, %s164_s30, %s1090_s4, %s1090_s4, %s1091_s1  }
  0x21   : > { %190 = sbr.rel (%p1171_p8) target bundleno = 270 (0x10e), region = 32  ;;  %s1213_s6 = sand.u32 (!%p1171_p8), 1, %s1069_s13  }
  0x22   : > { %s752_s9 = sshll.u32 (!%p1171_p8), %s1213_s6, 8  ;;  %s193_s11 = scalar_lea.sflag (!%p1171_p8), [#allocation4], %s1213_s6 }
  0x23   : > { %s1217_s19 = scalar_lea.vmem (!%p1171_p8), [#allocation3], %s752_s9 }
  0x26   : > { %1052 = dma.done.wait (%p1158_p4), %s193_s11, 4096  }
  0x27   : > { %1054 = vsyncadd (%p1158_p4), %s193_s11, 4294963200 }
  0x28   : > { %1056 = dma.done.wait (%p1148_p1), [#allocation7], 2048  }
  0x29   : > { %1058 = vsyncadd (%p1148_p1), [#allocation7], 4294965248  ;;  %v833_v0 = vld [vmem:[#allocation6 + $0x38] sm:$0xff]  ;;  %v832_v2 = vld [vmem:[#allocation6 + $0x30] sm:$0xff]  ;;  %s754_s1 = sshll.u32 %s1213_s6, 7  ;;  %s842_s7 = sshll.u32 %s1077_s15, 7 }
  0x2a   : > { %v841_v1 = vld [vmem:[#allocation6 + $0x78] sm:$0xff]  ;;  %445 = vmatpush.bf16.msra.mxu0 %v833_v0  ;;  %843 = vmatpush.bf16.msra.mxu2 %v833_v0  ;;  %v840_v3 = vld [vmem:[#allocation6 + $0x70] sm:$0xff]  ;;  %v831_v4 = vld [vmem:[#allocation6 + $0x28] sm:$0xff]  ;;  %s1266_s27 = scalar_lea.vmem [#allocation8], %s754_s1  ;;  %s642_s25 = scalar_lea.hbm %s1341_s3, %s842_s7 }
  0x2b   : > { %494 = vmatpush.bf16.msra.mxu1 %v841_v1  ;;  %851 = vmatpush.bf16.msra.mxu3 %v841_v1  ;;  %v839_v5 = vld [vmem:[#allocation6 + $0x68] sm:$0xff]  ;;  %v830_v6 = vld [vmem:[#allocation6 + $0x20] sm:$0xff]  ;;  %v829_v8 = vld [vmem:[#allocation6 + $0x18] sm:$0xff]  ;;  %s643_s26 = sshll.u32 %s1266_s27, 4  ;;  %s645_s28 = sshll.u32 %s642_s25, 4  ;;  %s644_s26 = int_to_ptr.vmem [resolvable:$true] %s643_s26  ;;  %s646_s28 = int_to_ptr.hbm [resolvable:$true] %s645_s28 }
  0x2c   : > { %v838_v7 = vld [vmem:[#allocation6 + $0x60] sm:$0xff]  ;;  %v837_v9 = vld [vmem:[#allocation6 + $0x58] sm:$0xff]  ;;  %v828_v10 = vld [vmem:[#allocation6 + $0x10] sm:$0xff]  ;;  %s631_s15 = scalar_lea.sflag [#allocation5], %s1213_s6  ;;  %s1013_s29 = sshra.s32 %s646_s28, 4  ;;  %s1014_s29 = int_to_ptr.hbm [resolvable:$true] %s1013_s29 }
  0x2d   : > { %v836_v11 = vld [vmem:[#allocation6 + $0x50] sm:$0xff]  ;;  %v827_v12 = vld [vmem:[#allocation6 + $0x8] sm:$0xff]  ;;  %v826_v14 = vld [vmem:[#allocation6] sm:$0xff]  ;;  %s1015_s21 = scalar_lea.hbm %s1014_s29, 128  ;;  %s1019_s9 = scalar_lea.hbm %s1341_s3, 256 }
  0x2e   : > { %446 = vmatpush.bf16.msra.mxu0 %v832_v2  ;;  %844 = vmatpush.bf16.msra.mxu2 %v832_v2  ;;  %v835_v13 = vld [vmem:[#allocation6 + $0x48] sm:$0xff]  ;;  %v834_v15 = vld [vmem:[#allocation6 + $0x40] sm:$0xff]  ;;  %v250_v17 = vld [vmem:[%s1217_s19 + $0x10] sm:$0xff]  ;;  %p1016_p1 = scmp.ne.s32.totalorder %s1014_s29, %s1015_s21  ;;  %p1020_p10 = scmp.lt.s32.totalorder %s1014_s29, %s1341_s3 }
  0x2f   : > { %495 = vmatpush.bf16.msra.mxu1 %v840_v3  ;;  %852 = vmatpush.bf16.msra.mxu3 %v840_v3  ;;  %v248_v16 = vld [vmem:[%s1217_s19] sm:$0xff]  ;;  %v266_v19 = vld [vmem:[%s1217_s19 + $0x90] sm:$0xff]  ;;  %v249_v20 = vld [vmem:[%s1217_s19 + $0x8] sm:$0xff]  ;;  %p1021_p12 = scmp.lt.s32.totalorder %s1019_s9, %s1015_s21 }
  0x30   : > { %v264_v18 = vld [vmem:[%s1217_s19 + $0x80] sm:$0xff]  ;;  %v251_v21 = vld [vmem:[%s1217_s19 + $0x18] sm:$0xff]  ;;  %v265_v22 = vld [vmem:[%s1217_s19 + $0x88] sm:$0xff]  ;;  %v280_v24 = vpack.c.bf16 %v250_v17, %v248_v16  ;;  %p1017_p4 = pnand %p1016_p1, %p1193_p5 }
  0x31   : > { %v267_v23 = vld [vmem:[%s1217_s19 + $0x98] sm:$0xff]  ;;  %v288_v25 = vpack.c.bf16 %v266_v19, %v264_v18  ;;  %v281_v26 = vpack.c.bf16 %v251_v21, %v249_v20  ;;  %v252_v28 = vld [vmem:[%s1217_s19 + $0x20] sm:$0xff]  ;;  %v254_v29 = vld [vmem:[%s1217_s19 + $0x30] sm:$0xff]  ;;  %p1022_p13 = por %p1021_p12, %p1020_p10 }
  0x32   : > { %447 = vmatpush.bf16.msra.mxu0 %v831_v4  ;;  %845 = vmatpush.bf16.msra.mxu2 %v831_v4  ;;  %v289_v27 = vpack.c.bf16 %v267_v23, %v265_v22  ;;  %v268_v30 = vld [vmem:[%s1217_s19 + $0xa0] sm:$0xff]  ;;  %v270_v31 = vld [vmem:[%s1217_s19 + $0xb0] sm:$0xff]  ;;  %v253_v32 = vld [vmem:[%s1217_s19 + $0x28] sm:$0xff]  ;;  %v282_v36 = vpack.c.bf16 %v254_v29, %v252_v28  ;;  %p1018_p8 = pneg %p1017_p4 }
  0x33   : > { %496 = vmatpush.bf16.msra.mxu1 %v839_v5  ;;  %853 = vmatpush.bf16.msra.mxu3 %v839_v5  ;;  %v255_v33 = vld [vmem:[%s1217_s19 + $0x38] sm:$0xff]  ;;  %v269_v34 = vld [vmem:[%s1217_s19 + $0xa8] sm:$0xff]  ;;  %v290_v37 = vpack.c.bf16 %v270_v31, %v268_v30  ;;  %v256_v40 = vld [vmem:[%s1217_s19 + $0x40] sm:$0xff] }
  0x34   : > { %v271_v35 = vld [vmem:[%s1217_s19 + $0xb8] sm:$0xff]  ;;  %v283_v38 = vpack.c.bf16 %v255_v33, %v253_v32  ;;  %v258_v41 = vld [vmem:[%s1217_s19 + $0x50] sm:$0xff]  ;;  %v272_v42 = vld [vmem:[%s1217_s19 + $0xc0] sm:$0xff]  ;;  %p1023_p0 = pnand %p1022_p13, %p1018_p8 }
  0x35   : > { %v291_v39 = vpack.c.bf16 %v271_v35, %v269_v34  ;;  %v274_v43 = vld [vmem:[%s1217_s19 + $0xd0] sm:$0xff]  ;;  %v257_v44 = vld [vmem:[%s1217_s19 + $0x48] sm:$0xff]  ;;  %v259_v45 = vld [vmem:[%s1217_s19 + $0x58] sm:$0xff]  ;;  %v284_v48 = vpack.c.bf16 %v258_v41, %v256_v40 }
  0x36   : > { %448 = vmatpush.bf16.msra.mxu0 %v830_v6  ;;  %846 = vmatpush.bf16.msra.mxu2 %v830_v6  ;;  %v273_v46 = vld [vmem:[%s1217_s19 + $0xc8] sm:$0xff]  ;;  %v275_v47 = vld [vmem:[%s1217_s19 + $0xd8] sm:$0xff]  ;;  %v292_v49 = vpack.c.bf16 %v274_v43, %v272_v42  ;;  %v285_v50 = vpack.c.bf16 %v259_v45, %v257_v44  ;;  %v260_v52 = vld [vmem:[%s1217_s19 + $0x60] sm:$0xff] }
  0x37   : > { %497 = vmatpush.bf16.msra.mxu1 %v838_v7  ;;  %854 = vmatpush.bf16.msra.mxu3 %v838_v7  ;;  %v293_v51 = vpack.c.bf16 %v275_v47, %v273_v46  ;;  %v262_v53 = vld [vmem:[%s1217_s19 + $0x70] sm:$0xff]  ;;  %v276_v54 = vld [vmem:[%s1217_s19 + $0xe0] sm:$0xff]  ;;  %v261_v56 = vld [vmem:[%s1217_s19 + $0x68] sm:$0xff] }
  0x38   : > { %v278_v55 = vld [vmem:[%s1217_s19 + $0xf0] sm:$0xff]  ;;  %v263_v57 = vld [vmem:[%s1217_s19 + $0x78] sm:$0xff]  ;;  %v277_v58 = vld [vmem:[%s1217_s19 + $0xe8] sm:$0xff]  ;;  %v286_v60 = vpack.c.bf16 %v262_v53, %v260_v52 }
  0x39   : > { %v279_v59 = vld [vmem:[%s1217_s19 + $0xf8] sm:$0xff]  ;;  %v294_v61 = vpack.c.bf16 %v278_v55, %v276_v54  ;;  %v287_v62 = vpack.c.bf16 %v263_v57, %v261_v56  ;;  %v1263_v1 = vld [vmem:[%s1340_s2] ss:$0 sm:$0xff] }
  0x3a   : > { %449 = vmatpush.bf16.msra.mxu0 %v829_v8  ;;  %847 = vmatpush.bf16.msra.mxu2 %v829_v8  ;;  %v295_v63 = vpack.c.bf16 %v279_v59, %v277_v58 }
  0x3b   : > { %498 = vmatpush.bf16.msra.mxu1 %v837_v9  ;;  %855 = vmatpush.bf16.msra.mxu3 %v837_v9 }
  0x3e   : > { %450 = vmatpush.bf16.msra.mxu0 %v828_v10  ;;  %848 = vmatpush.bf16.msra.mxu2 %v828_v10 }
  0x3f   : > { %499 = vmatpush.bf16.msra.mxu1 %v836_v11  ;;  %856 = vmatpush.bf16.msra.mxu3 %v836_v11 }
  0x42   : > { %451 = vmatpush.bf16.msra.mxu0 %v827_v12  ;;  %849 = vmatpush.bf16.msra.mxu2 %v827_v12 }
  0x43   : > { %500 = vmatpush.bf16.msra.mxu1 %v835_v13  ;;  %857 = vmatpush.bf16.msra.mxu3 %v835_v13 }
  0x46   : > { %452 = vmatpush.bf16.msra.mxu0 %v826_v14  ;;  %850 = vmatpush.bf16.msra.mxu2 %v826_v14 }
  0x47   : > { %501 = vmatpush.bf16.msra.mxu1 %v834_v15  ;;  %858 = vmatpush.bf16.msra.mxu3 %v834_v15 }
  0x49   : > { %453 = vmatmul.bf16.vlgmr.msra.gmra.mxu0 %v280_v24  ;;  %473 = vmatmul.bf16.vlgmr.msra.gmra.mxu2 %v288_v25 }
  0x4a   : > { %502 = vmatmul.bf16.vlgmr.msra.gmra.mxu1 %v281_v26  ;;  %522 = vmatmul.bf16.vlgmr.msra.gmra.mxu3 %v289_v27 }
  0x59   : > { %458 = vmatmul.bf16.gmra.mxu0 %v282_v36  ;;  %478 = vmatmul.bf16.gmra.mxu2 %v290_v37 }
  0x5a   : > { %507 = vmatmul.bf16.gmra.mxu1 %v283_v38  ;;  %527 = vmatmul.bf16.gmra.mxu3 %v291_v39 }
  0x69   : > { %463 = vmatmul.bf16.gmra.mxu0 %v284_v48  ;;  %483 = vmatmul.bf16.gmra.mxu2 %v292_v49 }
  0x6a   : > { %512 = vmatmul.bf16.gmra.mxu1 %v285_v50  ;;  %532 = vmatmul.bf16.gmra.mxu3 %v293_v51 }
  0x79   : > { %468 = vmatmul.bf16.gmra.mxu0 %v286_v60  ;;  %488 = vmatmul.bf16.gmra.mxu2 %v294_v61 }
  0x7a   : > { %517 = vmatmul.bf16.gmra.mxu1 %v287_v62  ;;  %537 = vmatmul.bf16.gmra.mxu3 %v295_v63 }
  0xc6   : > { %v454_v0 = vpop.f32.mrf.mxu0 }
  0xc7   : > { %v503_v2 = vpop.f32.mrf.mxu1 }
  0xc8   : > { %v504_v3 = vadd.f32 %v503_v2, %v454_v0 }
  0xca   : > { %v598_v4 = vadd.f32 %v1263_v1, %v504_v3 }
  0xcc   : > { %614 = vst [vmem:[%s1266_s27] sm:$0xff] %v598_v4  ;;  %v474_v5 = vpop.f32.mrf.mxu2 }
  0xcd   : > { %v523_v6 = vpop.f32.mrf.mxu3 }
  0xce   : > { %v524_v7 = vadd.f32 %v523_v6, %v474_v5  ;;  %v456_v8 = vpop.f32.mrf.mxu0 }
  0xcf   : > { %v505_v9 = vpop.f32.mrf.mxu1 }
  0xd0   : > { %v606_v10 = vadd.f32 %v1263_v1, %v524_v7  ;;  %v506_v11 = vadd.f32 %v505_v9, %v456_v8 }
  0xd2   : > { %622 = vst [vmem:[%s1266_s27 + $0x40] sm:$0xff] %v606_v10  ;;  %v599_v12 = vadd.f32 %v1263_v1, %v506_v11 }
  0xd4   : > { %615 = vst [vmem:[%s1266_s27 + $0x8] sm:$0xff] %v599_v12  ;;  %v476_v13 = vpop.f32.mrf.mxu2 }
  0xd5   : > { %v525_v14 = vpop.f32.mrf.mxu3 }
  0xd6   : > { %v526_v15 = vadd.f32 %v525_v14, %v476_v13  ;;  %v459_v16 = vpop.f32.mrf.mxu0 }
  0xd7   : > { %v508_v17 = vpop.f32.mrf.mxu1 }
  0xd8   : > { %v607_v18 = vadd.f32 %v1263_v1, %v526_v15  ;;  %v509_v19 = vadd.f32 %v508_v17, %v459_v16 }
  0xda   : > { %623 = vst [vmem:[%s1266_s27 + $0x48] sm:$0xff] %v607_v18  ;;  %v600_v20 = vadd.f32 %v1263_v1, %v509_v19 }
  0xdc   : > { %616 = vst [vmem:[%s1266_s27 + $0x10] sm:$0xff] %v600_v20  ;;  %v479_v21 = vpop.f32.mrf.mxu2 }
  0xdd   : > { %v528_v22 = vpop.f32.mrf.mxu3 }
  0xde   : > { %v529_v23 = vadd.f32 %v528_v22, %v479_v21  ;;  %v461_v24 = vpop.f32.mrf.mxu0 }
  0xdf   : > { %v510_v25 = vpop.f32.mrf.mxu1 }
  0xe0   : > { %v608_v26 = vadd.f32 %v1263_v1, %v529_v23  ;;  %v511_v27 = vadd.f32 %v510_v25, %v461_v24 }
  0xe2   : > { %624 = vst [vmem:[%s1266_s27 + $0x50] sm:$0xff] %v608_v26  ;;  %v601_v28 = vadd.f32 %v1263_v1, %v511_v27 }
  0xe4   : > { %617 = vst [vmem:[%s1266_s27 + $0x18] sm:$0xff] %v601_v28  ;;  %v481_v29 = vpop.f32.mrf.mxu2 }
  0xe5   : > { %v530_v30 = vpop.f32.mrf.mxu3 }
  0xe6   : > { %v531_v31 = vadd.f32 %v530_v30, %v481_v29  ;;  %v464_v32 = vpop.f32.mrf.mxu0 }
  0xe7   : > { %v513_v33 = vpop.f32.mrf.mxu1 }
  0xe8   : > { %v609_v34 = vadd.f32 %v1263_v1, %v531_v31  ;;  %v514_v35 = vadd.f32 %v513_v33, %v464_v32 }
  0xea   : > { %625 = vst [vmem:[%s1266_s27 + $0x58] sm:$0xff] %v609_v34  ;;  %v602_v36 = vadd.f32 %v1263_v1, %v514_v35 }
  0xec   : > { %618 = vst [vmem:[%s1266_s27 + $0x20] sm:$0xff] %v602_v36  ;;  %v484_v37 = vpop.f32.mrf.mxu2 }
  0xed   : > { %v533_v38 = vpop.f32.mrf.mxu3 }
  0xee   : > { %v534_v39 = vadd.f32 %v533_v38, %v484_v37  ;;  %v466_v40 = vpop.f32.mrf.mxu0 }
  0xef   : > { %v515_v41 = vpop.f32.mrf.mxu1 }
  0xf0   : > { %v610_v42 = vadd.f32 %v1263_v1, %v534_v39  ;;  %v516_v43 = vadd.f32 %v515_v41, %v466_v40 }
  0xf2   : > { %626 = vst [vmem:[%s1266_s27 + $0x60] sm:$0xff] %v610_v42  ;;  %v603_v44 = vadd.f32 %v1263_v1, %v516_v43 }
  0xf4   : > { %619 = vst [vmem:[%s1266_s27 + $0x28] sm:$0xff] %v603_v44  ;;  %v486_v45 = vpop.f32.mrf.mxu2 }
  0xf5   : > { %v535_v46 = vpop.f32.mrf.mxu3 }
  0xf6   : > { %v536_v47 = vadd.f32 %v535_v46, %v486_v45  ;;  %v469_v48 = vpop.f32.mrf.mxu0 }
  0xf7   : > { %v518_v49 = vpop.f32.mrf.mxu1 }
  0xf8   : > { %v611_v50 = vadd.f32 %v1263_v1, %v536_v47  ;;  %v519_v51 = vadd.f32 %v518_v49, %v469_v48 }
  0xfa   : > { %627 = vst [vmem:[%s1266_s27 + $0x68] sm:$0xff] %v611_v50  ;;  %v604_v52 = vadd.f32 %v1263_v1, %v519_v51 }
  0xfc   : > { %620 = vst [vmem:[%s1266_s27 + $0x30] sm:$0xff] %v604_v52  ;;  %v489_v53 = vpop.f32.mrf.mxu2 }
  0xfd   : > { %v538_v54 = vpop.f32.mrf.mxu3 }
  0xfe   : > { %v539_v55 = vadd.f32 %v538_v54, %v489_v53  ;;  %v471_v56 = vpop.f32.mrf.mxu0 }
  0xff   : > { %v520_v57 = vpop.f32.mrf.mxu1 }
 0x100   : > { %v612_v58 = vadd.f32 %v1263_v1, %v539_v55  ;;  %v521_v59 = vadd.f32 %v520_v57, %v471_v56 }
 0x102   : > { %628 = vst [vmem:[%s1266_s27 + $0x70] sm:$0xff] %v612_v58  ;;  %v605_v60 = vadd.f32 %v1263_v1, %v521_v59 }
 0x104   : > { %621 = vst [vmem:[%s1266_s27 + $0x38] sm:$0xff] %v605_v60  ;;  %v491_v61 = vpop.f32.mrf.mxu2 }
 0x105   : > { %v540_v62 = vpop.f32.mrf.mxu3 }
 0x106   : > { %v541_v63 = vadd.f32 %v540_v62, %v491_v61 }
 0x108   : > { %v613_v0 = vadd.f32 %v1263_v1, %v541_v63 }
 0x10a   : > { %629 = vst [vmem:[%s1266_s27 + $0x78] sm:$0xff] %v613_v0 }
 0x10b   : > { %1026 = shalt.err (!%p1023_p0)
}
 0x10c   : > { %s1092_s6 = smov 128   ;;  %s1093_s1 = smov 8  }
 0x10d   : > { %865 = dma.vmem_to_hbm [thread:$0]  (%p1193_p5), %s644_s26, 2048, %s646_s28, %s631_s15, %s1092_s6, %s1092_s6, %s1093_s1  }
 0x10e PF: > { %s660_s20 = sand.u32 1, %s1065_s12   ;;  %p876_p3 = pnand %p746_p11, %p1163_p6 }
 0x10f   : > { %s661_s22 = scalar_lea.sflag [#allocation5], %s660_s20 }
 0x110   : > { %p877_p7 = pneg %p876_p3 }
 0x112   : > { %1060 = dma.done.wait (%p877_p7), %s661_s22, 2048  }
 0x113   : > { %1062 = vsyncadd (%p877_p7), %s661_s22, 4294965248  ;;  %s20_s17 = sadd.s32 1, %s1085_s17   ;;  %s1351_s12 = smov %s1069_s13 }
 0x114   : > { %p17_p9 = scmp.ge.s32.totalorder %s20_s17, 4   ;;  %s1352_s13 = smov %s1073_s14 }
 0x115   : > { %s1353_s14 = smov %s1202_s18  ;;  %s1354_s15 = smov %s1081_s16 }
 0x116   : > { %s1355_s16 = smov %s1357_s5  ;;  %19 = sbr.rel (!%p17_p9) target bundleno = 9 (0x9), region = 90 }
 0x11b   :  { %667 = vsyncpa [#allocation4], 1 }
 0x11c   :  { %669 = vsyncpa [#allocation4 + $0x1], 1 }
 0x11d   :  { %670 = vsyncpa [#allocation7], 1 }
 0x11e   :  { %671 = vsyncpa [#allocation5], 1 }
 0x11f   :  { %673 = vsyncpa [#allocation5 + $0x1], 1 }

</bundles_post_ra>
